<compile_context>
chip_gen: v7x
topology: tpu7x:2x2x1
jax: 0.10.0
libtpu: 0.0.40
codegen_flags: <defaults>
</compile_context>

<pallas_src>
import math

import jax
import jax.numpy as jnp
from jax.experimental import pallas as pl
from jax.experimental.pallas import tpu as pltpu


SUBLANE = 8
LANE = 128
MAX_BLOCK_B = 4096   # batch (lane) tile cap; <1 MiB/step double-buffered


def _round_up(x, m):
    return ((x + m - 1) // m) * m


def _choose_block_b(batch):
    """Pick the batch (lane) tile.

    As large as possible (amortizes the ~0.35 us/step fixed grid overhead),
    but keep >= 2 grid tiles once there is enough work so both v7x TensorCores
    get a share, and cap at MAX_BLOCK_B.
    """
    bp = _round_up(max(batch, 1), LANE)
    cand = _round_up(pl.cdiv(bp, 2), LANE) if bp >= 2 * LANE else bp
    return max(LANE, min(MAX_BLOCK_B, cand))


def _mlp_kernel(x_ref, w1_ref, b1_ref, w2_ref, b2_ref, q_ref, act_ref):
    """One batch (lane) tile of Linear -> Tanh -> Linear + fused argmax.

    Shapes (batch on lanes):
      x_ref  : (IN_PAD, block_b)   compute dtype (f32 or bf16)
      w1_ref : (HID_PAD, IN_PAD)   compute dtype
      b1_ref : (HID_PAD, 1)        f32
      w2_ref : (out_dim, HID_PAD)  compute dtype
      b2_ref : (out_dim, 1)        f32
      q_ref  : (out_dim, block_b)  f32
      act_ref: (1, block_b)        int32
    """
    x = x_ref[...]
    # hidden = W1^T @ x  -> (HID_PAD, block_b); MXU matmul, f32 accumulate.
    h = jnp.dot(w1_ref[...], x, preferred_element_type=jnp.float32)
    h = jnp.tanh(h + b1_ref[...])                       # bias + tanh in f32 (EUP)
    # q = W2^T @ h  -> (out_dim, block_b)
    q = jnp.dot(w2_ref[...], h.astype(w2_ref.dtype),
                preferred_element_type=jnp.float32)
    q = q + b2_ref[...]
    q_ref[...] = q

    # Fused argmax over the (small, un-padded) action axis: first index of the
    # max, computed with a sublane max-reduce + compare (no variadic reduce).
    n_act = q.shape[0]
    row_ids = jax.lax.broadcasted_iota(jnp.int32, q.shape, 0)
    q_max = jnp.max(q, axis=0, keepdims=True)
    first_max = jnp.min(jnp.where(q == q_max, row_ids, n_act),
                        axis=0, keepdims=True)
    act_ref[...] = first_max.astype(jnp.int32)


def prepare_params(w1, b1, w2, b2, compute_dtype=jnp.float32):
    """One-time parameter preparation (hoisted out of the per-call path).

    Inputs use the x @ W convention: w1 (in_dim, hidden), b1 (1, hidden) or
    (hidden,), w2 (hidden, out_dim), b2 (1, out_dim) or (out_dim,).
    Returns (w1t, b1t, w2t, b2t) in the batch-on-lanes kernel layout, padded
    to hardware tiles.  Zero padding keeps the math identical (tanh(0)=0,
    zero weight rows/cols contribute nothing).
    """
    in_dim, hidden = w1.shape
    out_dim = w2.shape[1]
    in_pad = _round_up(in_dim, SUBLANE)
    hid_pad = _round_up(hidden, SUBLANE)

    w1t = jnp.zeros((hid_pad, in_pad), compute_dtype).at[:hidden, :in_dim].set(
        jnp.asarray(w1).T.astype(compute_dtype))
    b1t = jnp.zeros((hid_pad, 1), jnp.float32).at[:hidden, 0].set(
        jnp.asarray(b1, jnp.float32).reshape(-1))
    w2t = jnp.zeros((out_dim, hid_pad), compute_dtype).at[:, :hidden].set(
        jnp.asarray(w2).T.astype(compute_dtype))
    b2t = jnp.asarray(b2, jnp.float32).reshape(out_dim, 1)
    return w1t, b1t, w2t, b2t


@jax.jit
def network_forward_and_act(x, w1t, b1t, w2t, b2t):
    """Batched forward pass + greedy action.

    x : (B, in_dim) f32 (same layout as the PyTorch nn.Linear input).
    Returns (q_values (B, out_dim) f32, actions (B,) int32).
    """
    B, in_dim = x.shape
    in_pad = w1t.shape[1]
    out_dim = w2t.shape[0]
    compute_dtype = w1t.dtype

    block_b = _choose_block_b(B)
    num_tiles = pl.cdiv(B, block_b)
    bp = num_tiles * block_b

    # Batch-on-lanes input slab: (in_pad, Bp).  in_dim rows on sublanes, batch
    # dense on 128-wide lanes -> no layout padding of the 8-wide feature dim.
    xt = jnp.zeros((in_pad, bp), compute_dtype).at[:in_dim, :B].set(
        x.T.astype(compute_dtype))

    q_t, act_t = pl.pallas_call(
        _mlp_kernel,
        out_shape=(
            jax.ShapeDtypeStruct((out_dim, bp), jnp.float32),
            jax.ShapeDtypeStruct((1, bp), jnp.int32),
        ),
        grid_spec=pltpu.PrefetchScalarGridSpec(
            num_scalar_prefetch=0,
            grid=(num_tiles,),
            in_specs=[
                # per-step activation tile (batch on lanes)
                pl.BlockSpec((in_pad, block_b), lambda i: (0, i)),
                # parameters: constant index_maps -> VMEM-resident across steps
                pl.BlockSpec(w1t.shape, lambda i: (0, 0)),
                pl.BlockSpec(b1t.shape, lambda i: (0, 0)),
                pl.BlockSpec(w2t.shape, lambda i: (0, 0)),
                pl.BlockSpec(b2t.shape, lambda i: (0, 0)),
            ],
            out_specs=[
                # (out_dim, block_b): full sublane extent, lane-dense stores
                pl.BlockSpec((out_dim, block_b), lambda i: (0, i)),
                pl.BlockSpec((1, block_b), lambda i: (0, i)),
            ],
        ),
        compiler_params=pltpu.CompilerParams(
            # batch tiles are independent -> split across TensorCores on v7x
            dimension_semantics=("parallel",),
        ),
    )(xt, w1t, b1t, w2t, b2t)

    return q_t[:, :B].T, act_t[0, :B]


def network_forward(x, params):
    """`Network.forward` equivalent: Q-values (B, out_dim)."""
    q, _ = network_forward_and_act(x, *params)
    return q


def act(x, params):
    """`Network.act` equivalent: greedy action per state (int32, (B,))."""
    _, a = network_forward_and_act(x, *params)
    return a


def init_params(key, in_dim, hidden, out_dim):
    """Deterministic init mimicking PyTorch nn.Linear (uniform +/- 1/sqrt(fan_in)).

    Stored as (in_features, out_features) so the math is y = x @ W + b.
    """
    k1, k2, k3, k4 = jax.random.split(key, 4)
    bound1 = 1.0 / math.sqrt(in_dim)
    bound2 = 1.0 / math.sqrt(hidden)
    w1 = jax.random.uniform(k1, (in_dim, hidden), jnp.float32, -bound1, bound1)
    b1 = jax.random.uniform(k2, (1, hidden), jnp.float32, -bound1, bound1)
    w2 = jax.random.uniform(k3, (hidden, out_dim), jnp.float32, -bound2, bound2)
    b2 = jax.random.uniform(k4, (1, out_dim), jnp.float32, -bound2, bound2)
    return w1, b1, w2, b2


if __name__ == "__main__":
    # info_transition = (6, 4): state = (player.x, player.y, goal.x, goal.y,
    # mark_obstacle, mark_vitesse); actions = (DOWN, RIGHT, LEFT, DASH)
    in_dim, hidden, out_dim = 6, 64, 4

    key = jax.random.PRNGKey(0)
    kx1, kx2, kp = jax.random.split(key, 3)
    w1, b1, w2, b2 = init_params(kp, in_dim, hidden, out_dim)

    def reference(x, dtype=jnp.float32):
        # Mirrors the kernel numerics: operands cast to `dtype`, f32 accumulate,
        # bias + tanh in f32.
        xc, w1c, w2c = x.astype(dtype), w1.astype(dtype), w2.astype(dtype)
        h = jnp.tanh(jnp.dot(xc, w1c, preferred_element_type=jnp.float32) + b1)
        return jnp.dot(h.astype(dtype), w2c,
                       preferred_element_type=jnp.float32) + b2

    # One-time parameter preparation (hoisted out of the per-call path).
    params_f32 = prepare_params(w1, b1, w2, b2, compute_dtype=jnp.float32)

    # 1) tiny batch (single-state `act()` path) -- exercises padding path
    x_small = jax.random.uniform(kx1, (2, in_dim), jnp.float32, 0.0, 15.0)
    q_small, a_small = jax.block_until_ready(
        network_forward_and_act(x_small, *params_f32))
    assert q_small.shape == (2, out_dim) and a_small.shape == (2,)
    assert jnp.allclose(q_small, reference(x_small), atol=1e-4), "small-batch mismatch"
    assert jnp.array_equal(a_small, jnp.argmax(q_small, axis=1)), "fused argmax mismatch"

    # 2) batched inference (replay batch / vectorized envs) -- exercises the grid
    x_big = jax.random.uniform(kx2, (1024, in_dim), jnp.float32, 0.0, 15.0)
    q_big, a_big = jax.block_until_ready(
        network_forward_and_act(x_big, *params_f32))
    assert q_big.shape == (1024, out_dim) and a_big.shape == (1024,)
    assert jnp.allclose(q_big, reference(x_big), atol=1e-4), "batched mismatch"
    assert jnp.array_equal(a_big, jnp.argmax(q_big, axis=1)), "batched argmax mismatch"

    # 3) bf16 MXU-operand path (recommended on v6e/v7x; accumulate/bias/tanh in f32)
    params_bf16 = prepare_params(w1, b1, w2, b2, compute_dtype=jnp.bfloat16)
    q_bf16, _ = jax.block_until_ready(
        network_forward_and_act(x_big, *params_bf16))
    assert jnp.allclose(q_bf16, reference(x_big, jnp.bfloat16),
                        atol=5e-2, rtol=1e-2), "bf16 mismatch"

    # `act` equivalent on the single-state path
    actions = jax.block_until_ready(act(x_small, params_f32))
    _action = int(actions[0])

    print("KERNEL_OK")
</pallas_src>

<mosaic_0001>
module attributes {stable_mosaic.version = 11 : i64} {
  func.func @_mlp_kernel(%arg0: i32, %arg1: memref<8x128xf32, #tpu.memory_space<vmem>>, %arg2: memref<64x8xf32, #tpu.memory_space<vmem>>, %arg3: memref<64x1xf32, #tpu.memory_space<vmem>>, %arg4: memref<4x64xf32, #tpu.memory_space<vmem>>, %arg5: memref<4x1xf32, #tpu.memory_space<vmem>>, %arg6: memref<4x128xf32, #tpu.memory_space<vmem>>, %arg7: memref<1x128xi32, #tpu.memory_space<vmem>>) attributes {dimension_semantics = [#tpu.dimension_semantics<parallel>], iteration_bounds = array<i64: 1>, scalar_prefetch = 0 : i64, scratch_operands = 0 : i64, tpu.core_type = #tpu.core_type<tc>, window_params = [{transform_indices = @transform_0, window_bounds = array<i64: 8, 128>}, {pipeline_mode = #tpu.pipeline_mode<synchronous>, transform_indices = @transform_1, window_bounds = array<i64: 64, 8>}, {pipeline_mode = #tpu.pipeline_mode<synchronous>, transform_indices = @transform_2, window_bounds = array<i64: 64, 1>}, {pipeline_mode = #tpu.pipeline_mode<synchronous>, transform_indices = @transform_3, window_bounds = array<i64: 4, 64>}, {pipeline_mode = #tpu.pipeline_mode<synchronous>, transform_indices = @transform_4, window_bounds = array<i64: 4, 1>}, {transform_indices = @transform_5, window_bounds = array<i64: 4, 128>}, {transform_indices = @transform_6, window_bounds = array<i64: 1, 128>}]} {
    %c0 = arith.constant 0 : index
    %c0_0 = arith.constant 0 : index
    %0 = vector.load %arg1[%c0, %c0_0] : memref<8x128xf32, #tpu.memory_space<vmem>>, vector<8x128xf32>
    %c0_1 = arith.constant 0 : index
    %c0_2 = arith.constant 0 : index
    %1 = vector.load %arg2[%c0_1, %c0_2] : memref<64x8xf32, #tpu.memory_space<vmem>>, vector<64x8xf32>
    %cst = arith.constant dense<0.000000e+00> : vector<64x128xf32>
    %2 = tpu.matmul %1, %0, %cst {dimension_numbers = #tpu.dot_dimension_numbers<[1], [0], [0], [1], [0, 0, 1, 1], [], []>} : vector<64x8xf32>, vector<8x128xf32>, vector<64x128xf32> -> vector<64x128xf32>
    %c0_3 = arith.constant 0 : index
    %c0_4 = arith.constant 0 : index
    %3 = vector.load %arg3[%c0_3, %c0_4] : memref<64x1xf32, #tpu.memory_space<vmem>>, vector<64x1xf32>
    %4 = vector.broadcast %3 : vector<64x1xf32> to vector<64x128xf32>
    %5 = arith.addf %2, %4 : vector<64x128xf32>
    %6 = math.tanh %5 : vector<64x128xf32>
    %c0_5 = arith.constant 0 : index
    %c0_6 = arith.constant 0 : index
    %7 = vector.load %arg4[%c0_5, %c0_6] : memref<4x64xf32, #tpu.memory_space<vmem>>, vector<4x64xf32>
    %cst_7 = arith.constant dense<0.000000e+00> : vector<4x128xf32>
    %8 = tpu.matmul %7, %6, %cst_7 {dimension_numbers = #tpu.dot_dimension_numbers<[1], [0], [0], [1], [0, 0, 1, 1], [], []>} : vector<4x64xf32>, vector<64x128xf32>, vector<4x128xf32> -> vector<4x128xf32>
    %c0_8 = arith.constant 0 : index
    %c0_9 = arith.constant 0 : index
    %9 = vector.load %arg5[%c0_8, %c0_9] : memref<4x1xf32, #tpu.memory_space<vmem>>, vector<4x1xf32>
    %10 = vector.broadcast %9 : vector<4x1xf32> to vector<4x128xf32>
    %11 = arith.addf %8, %10 : vector<4x128xf32>
    %c0_10 = arith.constant 0 : index
    %c0_11 = arith.constant 0 : index
    %12 = vector.load %arg6[%c0_10, %c0_11] : memref<4x128xf32, #tpu.memory_space<vmem>>, vector<4x128xf32>
    tpu.vector_store %arg6[%c0_10, %c0_11], %11 {strides = array<i32>} : memref<4x128xf32, #tpu.memory_space<vmem>>, vector<4x128xf32>,
    %13 = tpu.iota {dimensions = array<i32: 0>} : vector<4x128xi32>
    %cst_12 = arith.constant dense<0xFF800000> : vector<128xf32>
    %14 = vector.multi_reduction <maximumf>, %11, %cst_12 [0] : vector<4x128xf32> to vector<128xf32>
    %15 = vector.shape_cast %14 : vector<128xf32> to vector<1x128xf32>
    %16 = vector.broadcast %15 : vector<1x128xf32> to vector<4x128xf32>
    %17 = arith.cmpf oeq, %11, %16 : vector<4x128xf32>
    %c4_i32 = arith.constant 4 : i32
    %18 = vector.broadcast %c4_i32 : i32 to vector<4x128xi32>
    %19 = arith.select %17, %13, %18 : vector<4x128xi1>, vector<4x128xi32>
    %cst_13 = arith.constant dense<2147483647> : vector<128xi32>
    %20 = vector.multi_reduction <minsi>, %19, %cst_13 [0] : vector<4x128xi32> to vector<128xi32>
    %21 = vector.shape_cast %20 : vector<128xi32> to vector<1x128xi32>
    %c0_14 = arith.constant 0 : index
    %c0_15 = arith.constant 0 : index
    %22 = vector.load %arg7[%c0_14, %c0_15] : memref<1x128xi32, #tpu.memory_space<vmem>>, vector<1x128xi32>
    tpu.vector_store %arg7[%c0_14, %c0_15], %21 {strides = array<i32>} : memref<1x128xi32, #tpu.memory_space<vmem>>, vector<1x128xi32>,
    return
  }
  func.func @transform_0(%arg0: i32) -> (i32, i32) {
    %c0_i32 = arith.constant 0 : i32
    %c0_i32_0 = arith.constant 0 : i32
    return %c0_i32, %arg0 : i32, i32
  }
  func.func @transform_1(%arg0: i32) -> (i32, i32) {
    %c0_i32 = arith.constant 0 : i32
    %c0_i32_0 = arith.constant 0 : i32
    %c0_i32_1 = arith.constant 0 : i32
    return %c0_i32, %c0_i32_0 : i32, i32
  }
  func.func @transform_2(%arg0: i32) -> (i32, i32) {
    %c0_i32 = arith.constant 0 : i32
    %c0_i32_0 = arith.constant 0 : i32
    %c0_i32_1 = arith.constant 0 : i32
    return %c0_i32, %c0_i32_0 : i32, i32
  }
  func.func @transform_3(%arg0: i32) -> (i32, i32) {
    %c0_i32 = arith.constant 0 : i32
    %c0_i32_0 = arith.constant 0 : i32
    %c0_i32_1 = arith.constant 0 : i32
    return %c0_i32, %c0_i32_0 : i32, i32
  }
  func.func @transform_4(%arg0: i32) -> (i32, i32) {
    %c0_i32 = arith.constant 0 : i32
    %c0_i32_0 = arith.constant 0 : i32
    %c0_i32_1 = arith.constant 0 : i32
    return %c0_i32, %c0_i32_0 : i32, i32
  }
  func.func @transform_5(%arg0: i32) -> (i32, i32) {
    %c0_i32 = arith.constant 0 : i32
    %c0_i32_0 = arith.constant 0 : i32
    return %c0_i32, %arg0 : i32, i32
  }
  func.func @transform_6(%arg0: i32) -> (i32, i32) {
    %c0_i32 = arith.constant 0 : i32
    %c0_i32_0 = arith.constant 0 : i32
    return %c0_i32, %arg0 : i32, i32
  }
}

</mosaic_0001>

<bundles_post_ra>
// kernel: network_forward_and_act.1
= control target key start
LH: loop header
LB: loop body
LE: loop exit
PB: predicated region body
PF: predicated region fallthrough
CT: control target
= control target key end

     0   :  { %vm79_vm0 = vcmask 64512   ;;  %v424_v3 = vmov 0   ;;  %v425_v19 = vmov 0.0|0.0   ;;  %vm426_vm1 = vmmov 0   ;;  %s534_s0 = inlined_call_operand.vmem [shape: f32[8,128], index: 0, kind: input, shape index: {}]   ;;  %s535_s1 = inlined_call_operand.vmem [shape: f32[64,8], index: 1, kind: input, shape index: {}]   ;;  %s536_s2 = inlined_call_operand.vmem [shape: f32[64,1], index: 2, kind: input, shape index: {}]   ;;  %s537_s4 = inlined_call_operand.vmem [shape: f32[4,1], index: 4, kind: input, shape index: {}]   ;;  %s538_s3 = inlined_call_operand.vmem [shape: f32[4,64], index: 3, kind: input, shape index: {}]   ;;  %s539_s5 = inlined_call_operand.vmem [shape: f32[4,128], index: 5, kind: output, shape index: {0}]   ;;  %s540_s6 = inlined_call_operand.vmem [shape: s32[1,128], index: 6, kind: output, shape index: {1}]  }
   0x1   :  { %v22_v0 = vld [vmem:[%s534_s0] sm:$0xff]  ;;  %v24_v2 = vld [vmem:[%s535_s1 + $0x8] sm:$0xff]  ;;  %406 = vset.pattern.permute.xlu0 %v424_v3  ;;  %407 = vset.pattern.permute.xlu1 %v424_v3  ;;  %v25_v4 = vld [vmem:[%s535_s1 + $0x10] sm:$0xff]  ;;  %v427_v20 = vmov 0.0   ;;  %vm224_vm2 = vcmask 523264   ;;  %vm301_vm3 = vcmask 1043456  }
   0x2   :  { %v23_v1 = vld [vmem:[%s535_s1] sm:$0xff]  ;;  %357 = vmatprep.subr.mxu0 %v22_v0  ;;  %v33_v6 = vld [vmem:[%s536_s2 + $0x10] sm:$0xff]  ;;  %v26_v7 = vld [vmem:[%s535_s1 + $0x18] sm:$0xff]  ;;  %390 = vmatprep.subr.bf16.mxu1 %v425_v19 }
   0x3   :  { %359 = vmatprep.mubr.msk.f32.mxu0 %vm79_vm0, %v23_v1  ;;  %358 = vmatpush3.msra.mxu0 %v22_v0  ;;  %v31_v5 = vld [vmem:[%s536_s2] sm:$0xff]  ;;  %v32_v9 = vld [vmem:[%s536_s2 + $0x8] sm:$0xff]  ;;  %v34_v10 = vld [vmem:[%s536_s2 + $0x18] sm:$0xff] }
   0x4   :  { %360 = vmatmul.mubr.msk.f32.vlgmr.msra.gmra.mrb[0].mxu0 %vm79_vm0, %v24_v2  ;;  %41 = vperm.xlu0 %406, %v31_v5   ;;  %v27_v8 = vld [vmem:[%s535_s1 + $0x20] sm:$0xff]  ;;  %v28_v11 = vld [vmem:[%s535_s1 + $0x28] sm:$0xff]  ;;  %v29_v12 = vld [vmem:[%s535_s1 + $0x30] sm:$0xff]  ;;  %v299_v2 = vlaneseq }
   0x5   :  { %362 = vmatprep.mubr.msk.f32.mxu0 %vm79_vm0, %v25_v4  ;;  %51 = vperm.xlu1 %407, %v33_v6   ;;  %v35_v13 = vld [vmem:[%s536_s2 + $0x20] sm:$0xff]  ;;  %v36_v14 = vld [vmem:[%s536_s2 + $0x28] sm:$0xff]  ;;  %v30_v15 = vld [vmem:[%s535_s1 + $0x38] sm:$0xff] }
   0x6   :  { %v37_v16 = vld [vmem:[%s536_s2 + $0x30] sm:$0xff]  ;;  %v38_v17 = vld [vmem:[%s536_s2 + $0x38] sm:$0xff]  ;;  %v218_v18 = vld [vmem:[%s537_s4] sm:$0xf]  ;;  %387 = vmatprep.mubr.msk.f32.mxu1 %vm426_vm1, %v427_v20  ;;  %v300_v5 = vshrl.u32 %v299_v2, 7 }
   0x7   :  { %v217_v57 = vld [vmem:[%s538_s3] sm:$0xf] }
   0x8   :  { %363 = vmatmul.mubr.msk.f32.gmra.mrb[2].mxu0 %vm79_vm0, %v26_v7  ;;  %46 = vperm.xlu0 %406, %v32_v9  }
   0x9   :  { %365 = vmatprep.mubr.msk.f32.mxu0 %vm79_vm0, %v27_v8  ;;  %56 = vperm.xlu1 %407, %v34_v10  }
   0xc   :  { %366 = vmatmul.mubr.msk.f32.gmra.mrb[4].mxu0 %vm79_vm0, %v28_v11  ;;  %61 = vperm.xlu0 %406, %v35_v13  }
   0xd   :  { %368 = vmatprep.mubr.msk.f32.mxu0 %vm79_vm0, %v29_v12  ;;  %66 = vperm.xlu1 %407, %v36_v14  }
  0x10   :  { %369 = vmatmul.mubr.msk.f32.gmra.mrb[6].mxu0 %vm79_vm0, %v30_v15  ;;  %71 = vperm.xlu0 %406, %v37_v16  }
  0x11   :  { %76 = vperm.xlu1 %407, %v38_v17  }
  0x14   :  { %221 = vperm.xlu0 %406, %v218_v18  }
  0x83   :  { %v42_v21 = vpop.permute.xlu0 %41 }
  0x84   :  { %v52_v22 = vpop.permute.xlu1 %51 }
  0x87   :  { %v47_v23 = vpop.permute.xlu0 %46 }
  0x88   :  { %v57_v24 = vpop.permute.xlu1 %56 }
  0x8b   :  { %v62_v34 = vpop.permute.xlu0 %61 }
  0x8c   :  { %v67_v32 = vpop.permute.xlu1 %66 }
  0x8f   :  { %v72_v42 = vpop.permute.xlu0 %71 }
  0x90   :  { %v77_v39 = vpop.permute.xlu1 %76 }
  0x93   :  { %v222_v58 = vpop.permute.xlu0 %221 }
  0xd7   :  { %v361_v25 = vpop.f32.mrb[0].mxu0 }
  0xd8   :  { %v176_v26 = vadd.f32 %v361_v25, %v47_v23  ;;  %v170_v27 = vpop.f32.mrb[1].mxu0 }
  0xd9   :  { %v171_v28 = vadd.f32 %v170_v27, %v42_v21 }
  0xda   :  { %408 = vtanh.f32 %v176_v26 }
  0xdb   :  { %410 = vtanh.f32 %v171_v28  ;;  %v364_v29 = vpop.f32.mrb[2].mxu0 }
  0xdc   :  { %v186_v30 = vadd.f32 %v364_v29, %v57_v24  ;;  %v180_v31 = vpop.f32.mrb[3].mxu0 }
  0xdd   :  { %v181_v33 = vadd.f32 %v180_v31, %v52_v22 }
  0xde   :  { %412 = vtanh.f32 %v186_v30 }
  0xdf   :  { %414 = vtanh.f32 %v181_v33  ;;  %v367_v35 = vpop.f32.mrb[4].mxu0 }
  0xe0   :  { %v196_v36 = vadd.f32 %v367_v35, %v67_v32  ;;  %v190_v37 = vpop.f32.mrb[5].mxu0 }
  0xe1   :  { %v191_v38 = vadd.f32 %v190_v37, %v62_v34 }
  0xe2   :  { %416 = vtanh.f32 %v196_v36 }
  0xe3   :  { %418 = vtanh.f32 %v191_v38  ;;  %v370_v40 = vpop.f32.mrb[6].mxu0 }
  0xe4   :  { %v409_v41 = vpop.eup %408  ;;  %v206_v43 = vadd.f32 %v370_v40, %v77_v39  ;;  %v200_v44 = vpop.f32.mrb[7].mxu0 }
  0xe5   :  { %v411_v45 = vpop.eup %410  ;;  %v201_v46 = vadd.f32 %v200_v44, %v72_v42 }
  0xe6   :  { %420 = vtanh.f32 %v206_v43  ;;  %v391_v47 = vpack.c.bf16 %v409_v41, %v411_v45 }
  0xe7   :  { %422 = vtanh.f32 %v201_v46 }
  0xe8   :  { %v413_v48 = vpop.eup %412  ;;  %392 = vmatpush3.bf16.msra.mxu1 %v391_v47 }
  0xe9   :  { %v415_v49 = vpop.eup %414  ;;  %393 = vmatprep.subr.bf16.mxu1 %v425_v19 }
  0xea   :  { %v394_v50 = vpack.c.bf16 %v413_v48, %v415_v49 }
  0xec   :  { %v417_v51 = vpop.eup %416  ;;  %395 = vmatpush3.bf16.msra.mxu1 %v394_v50 }
  0xed   :  { %v419_v52 = vpop.eup %418  ;;  %396 = vmatprep.subr.bf16.mxu1 %v425_v19 }
  0xee   :  { %v397_v53 = vpack.c.bf16 %v417_v51, %v419_v52 }
  0xf0   :  { %v421_v54 = vpop.eup %420  ;;  %398 = vmatpush3.bf16.msra.mxu1 %v397_v53 }
  0xf1   :  { %v423_v55 = vpop.eup %422  ;;  %399 = vmatprep.subr.bf16.mxu1 %v425_v19 }
  0xf2   :  { %v400_v56 = vpack.c.bf16 %v421_v54, %v423_v55 }
  0xf4   :  { %401 = vmatpush3.bf16.msra.mxu1 %v400_v56 }
  0xf7   :  { %388 = vmatmul.mubr.msk.f32.vlgmr.msra.gmra.mrb[0].mxu1 %vm224_vm2, %v217_v57 }
 0x1ca   :  { %v294_v59 = vpop.f32.mrb[0].mxu1 }
 0x1cb   :  { %v295_v60 = vadd.f32 %v294_v59, %v222_v58  ;;  %v389_v61 = vpop.f32.mrb[1].mxu1 }
 0x1cd   :  { %298 = vst [vmem:[%s539_s5] sm:$0xf] %v295_v60  ;;  %v302_v62 = vsel %vm301_vm3, %v295_v60, -inf }
 0x1ce   :  { %v303_v63 = vrot.slane %v302_v62, 4 }
 0x1d0   :  { %v304_v0 = vmax.f32 %v302_v62, %v303_v63 }
 0x1d2   :  { %v305_v1 = vrot.slane %v304_v0, 2 }
 0x1d4   :  { %v306_v3 = vmax.f32 %v304_v0, %v305_v1 }
 0x1d6   :  { %v307_v4 = vrot.slane %v306_v3, 1 }
 0x1d8   :  { %v308_v6 = vmax.f32 %v306_v3, %v307_v4 }
 0x1da   :  { %vm309_vm4 = vcmp.eq.f32.partialorder %v295_v60, %v308_v6 }
 0x1db   :  { %v310_v7 = vsel %vm309_vm4, %v300_v5, 4 }
 0x1dc   :  { %v311_v8 = vsel %vm301_vm3, %v310_v7, 2147483647 }
 0x1dd   :  { %v312_v9 = vrot.slane %v311_v8, 4 }
 0x1df   :  { %vm313_vm5 = vcmp.lt.s32.totalorder %v311_v8, %v312_v9 }
 0x1e0   :  { %v314_v10 = vsel %vm313_vm5, %v311_v8, %v312_v9 }
 0x1e1   :  { %v315_v11 = vrot.slane %v314_v10, 2 }
 0x1e3   :  { %vm316_vm6 = vcmp.lt.s32.totalorder %v314_v10, %v315_v11 }
 0x1e4   :  { %v317_v12 = vsel %vm316_vm6, %v314_v10, %v315_v11 }
 0x1e5   :  { %v318_v13 = vrot.slane %v317_v12, 1 }
 0x1e7   :  { %vm319_vm7 = vcmp.lt.s32.totalorder %v317_v12, %v318_v13 }
 0x1e8   :  { %v320_v14 = vsel %vm319_vm7, %v317_v12, %v318_v13 }
 0x1e9   :  { %321 = vst [vmem:[%s540_s6] sm:$0x1] %v320_v14 }

</bundles_post_ra>
